<compile_context>
chip_gen: v7x
topology: tpu7x:2x2x1
jax: 0.10.0
libtpu: 0.0.40
codegen_flags: <defaults>
</compile_context>

<pallas_src>
import functools

import jax
import jax.numpy as jnp
from jax.experimental import pallas as pl
from jax.experimental.pallas import tpu as pltpu

HIDDEN = 64
LANE = 128


def _round_up(x, m):
    return ((x + m - 1) // m) * m


def mlp_kernel(x_ref, cols_ref, w2_ref, w3_ref, o_ref):
    # x_ref: (1, tm) batch-on-lanes; hidden activations are (HIDDEN, tm).
    x = x_ref[...]                                    # (1, tm) f32
    w1 = cols_ref[:, 0:1]                             # (H, 1) layer-1 weight column
    b1 = cols_ref[:, 1:2]                             # (H, 1)
    b2 = cols_ref[:, 2:3]                             # (H, 1)
    b3 = cols_ref[:, 3:4]                             # (H, 1)
    w4 = cols_ref[:, 4:5]                             # (H, 1) layer-4 weight column
    b4 = cols_ref[0:1, 5:6]                           # (1, 1)

    dot_dtype = w2_ref.dtype                          # bf16 (or f32 test path)

    # Layer 1: Linear(1, H) is an outer product -> VPU broadcast multiply.
    # Kept in f32 (v5e VPU has no bf16).
    h = jnp.maximum(w1 * x + b1, 0.0)                 # (H, tm) f32

    # Layers 2-3: bf16 operands on the MXU, f32 accumulation.
    h = jnp.maximum(
        jnp.dot(w2_ref[...], h.astype(dot_dtype),
                preferred_element_type=jnp.float32) + b2, 0.0)
    h = jnp.maximum(
        jnp.dot(w3_ref[...], h.astype(dot_dtype),
                preferred_element_type=jnp.float32) + b3, 0.0)

    # Layer 4: Linear(H, 1) off the MXU -> VPU multiply + cross-sublane reduce
    # (uses otherwise-idle VPU/XLU slots while the MXU streams layers 2-3).
    o_ref[...] = jnp.sum(w4 * h, axis=0, keepdims=True) + b4


@functools.partial(jax.jit, static_argnames=("tm", "use_bf16"))
def mlp_forward(l_tilde, params, *, tm=8192, use_bf16=True):
    """l_tilde: (N,) float32; returns (N,) float32."""
    w1, b1, w2, b2, w3, b3, w4, b4 = params
    n = l_tilde.shape[0]

    # Lane-aligned row tile. Shrink to the (lane-padded) batch when it is
    # small, and split into >=2 grid steps when possible so the "parallel"
    # axis can shard across v7x's two TensorCores (costs at most one extra
    # ~0.35us pipeline step on single-core chips).
    tm = max(LANE, _round_up(tm, LANE))
    n_lane = _round_up(n, LANE)
    tm_eff = min(tm, n_lane)
    if tm_eff == n_lane and n_lane >= 2 * LANE:
        tm_eff = _round_up(pl.cdiv(n_lane, 2), LANE)
    n_pad = _round_up(n, tm_eff)
    grid = n_pad // tm_eff
    # NOTE: at tm<=8192 total VMEM use is a few MiB, far under the 32 MiB
    # scoped default on every generation; raise vmem_limit_bytes only if tm is
    # pushed past ~16K.

    x = jnp.pad(l_tilde.astype(jnp.float32), (0, n_pad - n)).reshape(1, n_pad)

    # Pack the six tiny per-feature params into one lane-dense (H, 6) block:
    # [w1 | b1 | b2 | b3 | w4^T | b4 (broadcast)].
    b4_col = jnp.broadcast_to(b4.reshape(1, 1), (HIDDEN, 1)).astype(jnp.float32)
    cols = jnp.concatenate(
        [w1, b1[:, None], b2[:, None], b3[:, None], w4.T, b4_col], axis=1)

    dot_dtype = jnp.bfloat16 if use_bf16 else jnp.float32
    w2_d = w2.astype(dot_dtype)
    w3_d = w3.astype(dot_dtype)

    out = pl.pallas_call(
        mlp_kernel,
        out_shape=jax.ShapeDtypeStruct((1, n_pad), jnp.float32),
        grid_spec=pltpu.PrefetchScalarGridSpec(
            num_scalar_prefetch=0,
            grid=(grid,),
            in_specs=[
                pl.BlockSpec((1, tm_eff), lambda i: (0, i)),          # x tile
                pl.BlockSpec((HIDDEN, 6), lambda i: (0, 0)),          # packed params
                pl.BlockSpec((HIDDEN, HIDDEN), lambda i: (0, 0)),     # W2
                pl.BlockSpec((HIDDEN, HIDDEN), lambda i: (0, 0)),     # W3
            ],
            out_specs=pl.BlockSpec((1, tm_eff), lambda i: (0, i)),
        ),
        compiler_params=pltpu.CompilerParams(
            dimension_semantics=("parallel",)),
    )(x, cols, w2_d, w3_d)
    return out[0, :n]


def init_params(key, input_size=1, hidden_size=HIDDEN, output_size=1):
    """Deterministic init matching nn.Linear's U(-1/sqrt(fan_in), +...).

    Weights are stored torch-style as (out_features, in_features), biases as
    (out_features,).
    """
    def linear(k, fan_in, fan_out):
        kw, kb = jax.random.split(k)
        bound = 1.0 / jnp.sqrt(jnp.float32(fan_in))
        w = jax.random.uniform(kw, (fan_out, fan_in), jnp.float32, -bound, bound)
        b = jax.random.uniform(kb, (fan_out,), jnp.float32, -bound, bound)
        return w, b

    k1, k2, k3, k4 = jax.random.split(key, 4)
    w1, b1 = linear(k1, input_size, hidden_size)
    w2, b2 = linear(k2, hidden_size, hidden_size)
    w3, b3 = linear(k3, hidden_size, hidden_size)
    w4, b4 = linear(k4, hidden_size, output_size)
    return (w1, b1, w2, b2, w3, b3, w4, b4)


def mlp_reference(l_tilde, params):
    w1, b1, w2, b2, w3, b3, w4, b4 = params
    x = l_tilde[:, None]
    h = jnp.maximum(x @ w1.T + b1, 0.0)
    h = jnp.maximum(h @ w2.T + b2, 0.0)
    h = jnp.maximum(h @ w3.T + b3, 0.0)
    return (h @ w4.T + b4)[:, 0]


if __name__ == "__main__":
    key = jax.random.PRNGKey(0)
    kp, kx = jax.random.split(key)
    params = init_params(kp)

    # Non-multiple batch exercises wrapper-side padding; the wrapper splits it
    # into two 512-wide tiles so the multi-step "parallel" grid path runs too.
    N = 1000
    l_tilde = jax.random.uniform(kx, (N,), jnp.float32, 0.5, 1.5)
    y_ref = mlp_reference(l_tilde, params)

    # Default (bf16 MXU operands, f32 accumulation) -> loosened tolerance.
    y = jax.block_until_ready(mlp_forward(l_tilde, params))
    assert y.shape == (N,)
    assert jnp.allclose(y, y_ref, atol=5e-2, rtol=5e-2), "bf16 path mismatch vs reference"

    # Full-f32 path with a small tile (multi-step grid) -> tight tolerance.
    y32 = jax.block_until_ready(mlp_forward(l_tilde, params, tm=256, use_bf16=False))
    assert jnp.allclose(y32, y_ref, atol=1e-5, rtol=1e-5), "f32 path mismatch vs reference"

    print("KERNEL_OK")
</pallas_src>

<mosaic_0001>
module attributes {stable_mosaic.version = 11 : i64} {
  func.func @mlp_kernel(%arg0: i32, %arg1: memref<1x512xf32, #tpu.memory_space<vmem>>, %arg2: memref<64x6xf32, #tpu.memory_space<vmem>>, %arg3: memref<64x64xbf16, #tpu.memory_space<vmem>>, %arg4: memref<64x64xbf16, #tpu.memory_space<vmem>>, %arg5: memref<1x512xf32, #tpu.memory_space<vmem>>) attributes {dimension_semantics = [#tpu.dimension_semantics<parallel>], iteration_bounds = array<i64: 2>, scalar_prefetch = 0 : i64, scratch_operands = 0 : i64, tpu.core_type = #tpu.core_type<tc>, window_params = [{transform_indices = @transform_0, window_bounds = array<i64: 1, 512>}, {pipeline_mode = #tpu.pipeline_mode<synchronous>, transform_indices = @transform_1, window_bounds = array<i64: 64, 6>}, {pipeline_mode = #tpu.pipeline_mode<synchronous>, transform_indices = @transform_2, window_bounds = array<i64: 64, 64>}, {pipeline_mode = #tpu.pipeline_mode<synchronous>, transform_indices = @transform_3, window_bounds = array<i64: 64, 64>}, {transform_indices = @transform_4, window_bounds = array<i64: 1, 512>}]} {
    %c0 = arith.constant 0 : index
    %c0_0 = arith.constant 0 : index
    %0 = vector.load %arg1[%c0, %c0_0] : memref<1x512xf32, #tpu.memory_space<vmem>>, vector<1x512xf32>
    %c0_1 = arith.constant 0 : index
    %c0_2 = arith.constant 0 : index
    %1 = vector.load %arg2[%c0_1, %c0_2] : memref<64x6xf32, #tpu.memory_space<vmem>>, vector<64x1xf32>
    %c0_3 = arith.constant 0 : index
    %c1 = arith.constant 1 : index
    %2 = vector.load %arg2[%c0_3, %c1] : memref<64x6xf32, #tpu.memory_space<vmem>>, vector<64x1xf32>
    %c0_4 = arith.constant 0 : index
    %c2 = arith.constant 2 : index
    %3 = vector.load %arg2[%c0_4, %c2] : memref<64x6xf32, #tpu.memory_space<vmem>>, vector<64x1xf32>
    %c0_5 = arith.constant 0 : index
    %c3 = arith.constant 3 : index
    %4 = vector.load %arg2[%c0_5, %c3] : memref<64x6xf32, #tpu.memory_space<vmem>>, vector<64x1xf32>
    %c0_6 = arith.constant 0 : index
    %c4 = arith.constant 4 : index
    %5 = vector.load %arg2[%c0_6, %c4] : memref<64x6xf32, #tpu.memory_space<vmem>>, vector<64x1xf32>
    %c0_7 = arith.constant 0 : index
    %c5 = arith.constant 5 : index
    %6 = vector.load %arg2[%c0_7, %c5] : memref<64x6xf32, #tpu.memory_space<vmem>>, vector<1x1xf32>
    %7 = vector.broadcast %1 : vector<64x1xf32> to vector<64x512xf32>
    %8 = vector.broadcast %0 : vector<1x512xf32> to vector<64x512xf32>
    %9 = arith.mulf %7, %8 : vector<64x512xf32>
    %10 = vector.broadcast %2 : vector<64x1xf32> to vector<64x512xf32>
    %11 = arith.addf %9, %10 : vector<64x512xf32>
    %cst = arith.constant 0.000000e+00 : f32
    %12 = vector.broadcast %cst : f32 to vector<64x512xf32>
    %13 = arith.maximumf %11, %12 : vector<64x512xf32>
    %c0_8 = arith.constant 0 : index
    %c0_9 = arith.constant 0 : index
    %14 = vector.load %arg3[%c0_8, %c0_9] : memref<64x64xbf16, #tpu.memory_space<vmem>>, vector<64x64xbf16>
    %15 = arith.truncf %13 : vector<64x512xf32> to vector<64x512xbf16>
    %cst_10 = arith.constant dense<0.000000e+00> : vector<64x512xf32>
    %16 = tpu.matmul %14, %15, %cst_10 {dimension_numbers = #tpu.dot_dimension_numbers<[1], [0], [0], [1], [0, 0, 1, 1], [], []>} : vector<64x64xbf16>, vector<64x512xbf16>, vector<64x512xf32> -> vector<64x512xf32>
    %17 = vector.broadcast %3 : vector<64x1xf32> to vector<64x512xf32>
    %18 = arith.addf %16, %17 : vector<64x512xf32>
    %cst_11 = arith.constant 0.000000e+00 : f32
    %19 = vector.broadcast %cst_11 : f32 to vector<64x512xf32>
    %20 = arith.maximumf %18, %19 : vector<64x512xf32>
    %c0_12 = arith.constant 0 : index
    %c0_13 = arith.constant 0 : index
    %21 = vector.load %arg4[%c0_12, %c0_13] : memref<64x64xbf16, #tpu.memory_space<vmem>>, vector<64x64xbf16>
    %22 = arith.truncf %20 : vector<64x512xf32> to vector<64x512xbf16>
    %cst_14 = arith.constant dense<0.000000e+00> : vector<64x512xf32>
    %23 = tpu.matmul %21, %22, %cst_14 {dimension_numbers = #tpu.dot_dimension_numbers<[1], [0], [0], [1], [0, 0, 1, 1], [], []>} : vector<64x64xbf16>, vector<64x512xbf16>, vector<64x512xf32> -> vector<64x512xf32>
    %24 = vector.broadcast %4 : vector<64x1xf32> to vector<64x512xf32>
    %25 = arith.addf %23, %24 : vector<64x512xf32>
    %cst_15 = arith.constant 0.000000e+00 : f32
    %26 = vector.broadcast %cst_15 : f32 to vector<64x512xf32>
    %27 = arith.maximumf %25, %26 : vector<64x512xf32>
    %28 = vector.broadcast %5 : vector<64x1xf32> to vector<64x512xf32>
    %29 = arith.mulf %28, %27 : vector<64x512xf32>
    %cst_16 = arith.constant dense<0.000000e+00> : vector<512xf32>
    %30 = vector.multi_reduction <add>, %29, %cst_16 [0] : vector<64x512xf32> to vector<512xf32>
    %31 = vector.shape_cast %30 : vector<512xf32> to vector<1x512xf32>
    %32 = vector.broadcast %6 : vector<1x1xf32> to vector<1x512xf32>
    %33 = arith.addf %31, %32 : vector<1x512xf32>
    %c0_17 = arith.constant 0 : index
    %c0_18 = arith.constant 0 : index
    %34 = vector.load %arg5[%c0_17, %c0_18] : memref<1x512xf32, #tpu.memory_space<vmem>>, vector<1x512xf32>
    tpu.vector_store %arg5[%c0_17, %c0_18], %33 {strides = array<i32>} : memref<1x512xf32, #tpu.memory_space<vmem>>, vector<1x512xf32>,
    return
  }
  func.func @transform_0(%arg0: i32) -> (i32, i32) {
    %c0_i32 = arith.constant 0 : i32
    %c0_i32_0 = arith.constant 0 : i32
    return %c0_i32, %arg0 : i32, i32
  }
  func.func @transform_1(%arg0: i32) -> (i32, i32) {
    %c0_i32 = arith.constant 0 : i32
    %c0_i32_0 = arith.constant 0 : i32
    %c0_i32_1 = arith.constant 0 : i32
    return %c0_i32, %c0_i32_0 : i32, i32
  }
  func.func @transform_2(%arg0: i32) -> (i32, i32) {
    %c0_i32 = arith.constant 0 : i32
    %c0_i32_0 = arith.constant 0 : i32
    %c0_i32_1 = arith.constant 0 : i32
    return %c0_i32, %c0_i32_0 : i32, i32
  }
  func.func @transform_3(%arg0: i32) -> (i32, i32) {
    %c0_i32 = arith.constant 0 : i32
    %c0_i32_0 = arith.constant 0 : i32
    %c0_i32_1 = arith.constant 0 : i32
    return %c0_i32, %c0_i32_0 : i32, i32
  }
  func.func @transform_4(%arg0: i32) -> (i32, i32) {
    %c0_i32 = arith.constant 0 : i32
    %c0_i32_0 = arith.constant 0 : i32
    return %c0_i32, %arg0 : i32, i32
  }
}

</mosaic_0001>

<bundles_post_ra>
// kernel: mlp_forward.1
= control target key start
LH: loop header
LB: loop body
LE: loop exit
PB: predicated region body
PF: predicated region fallthrough
CT: control target
= control target key end

     0   :  { %9 = vsyncpa [#allocation3], 0  ;;  %s1701_s0 = inlined_call_operand.vmem [shape: f32[1,1024], index: 0, kind: input, shape index: {}]   ;;  %s1702_s1 = inlined_call_operand.vmem [shape: f32[64,6], index: 1, kind: input, shape index: {}]   ;;  %s1703_s2 = inlined_call_operand.vmem [shape: bf16[64,64], index: 2, kind: input, shape index: {}]   ;;  %s1704_s3 = inlined_call_operand.vmem [shape: bf16[64,64], index: 3, kind: input, shape index: {}]   ;;  %s1705_s4 = inlined_call_operand.hbm [shape: f32[1,1024], index: 4, kind: output, shape index: {}]  }
   0x1   :  { %11 = vsyncpa [#allocation3 + $0x1], 0  ;;  %s1368_s15 = smov 0   ;;  %s1370_s16 = smov 0  }
   0x2   :  { %s1372_s17 = smov 0   ;;  %s1374_s18 = smov 0  }
   0x3 LB: > { %s1389_s19 = sadd.s32 4294967295, %s1333_s18   ;;  %s1159_s20 = sadd.s32 4294967294, %s1333_s18   ;;  %s1333_s18 = sphi %s1374_s18, %s1711_s18   ;;  %s1329_s17 = sphi %s1372_s17, %s1710_s17   ;;  %s1325_s16 = sphi %s1370_s16, %s1709_s16   ;;  %s1321_s15 = sphi %s1368_s15, %s1708_s15  }
   0x4   : > { %s1393_s21 = sadd.s32 1, %s1333_s18   ;;  %s113_s22 = sadd.s32 1, %s1329_s17 }
   0x5   : > { %s110_s23 = ssub.s32 %s1333_s18, %s1393_s21  ;;  %p123_p0 = scmp.ne.s32.totalorder %s1329_s17, %s1325_s16 }
   0x6   : > { %p111_p1 = scmp.eq.s32.totalorder %s110_s23, 0  ;;  %p124_p2 = scmp.eq.s32.totalorder %s1389_s19, 1 }
   0x7   : > { %p129_p3 = scmp.ne.s32.totalorder %s1325_s16, %s1321_s15  ;;  %p130_p4 = scmp.eq.s32.totalorder %s1159_s20, 1 }
   0x8   : > { %s1404_s24 = scalar_select %p111_p1, %s1329_s17, %s113_s22  }
   0x9   : > { %p1406_p5 = por %p124_p2, %p123_p0  ;;  %p1410_p6 = por %p130_p4, %p129_p3 }
   0xa   : > { %p1162_p7 = scmp.ge.s32.totalorder %s1333_s18, 1  ;;  %p165_p8 = scmp.lt.s32.totalorder %s1333_s18, 3 }
   0xc   : > { %p166_p9 = pnand %p1162_p7, %p165_p8 }
   0xd   : > { %v1419_v0 = vld [vmem:[%s1702_s1 + $0x10] sm:$0xff] (!%p166_p9)  ;;  %v1424_v1 = vld [vmem:[%s1702_s1] sm:$0xff] (!%p166_p9)  ;;  %v1335_v2 = vmov (!%p166_p9), 1   ;;  %v1431_v3 = vld [vmem:[%s1702_s1 + $0x8] sm:$0xff] (!%p166_p9)  ;;  %v1336_v4 = vmov (!%p166_p9), 0   ;;  %v1337_v10 = vmov (!%p166_p9), 2   ;;  %v248_v11 = vlaneseq (!%p166_p9) }
   0xe   : > { %169 = sbr.rel (%p166_p9) target bundleno = 723 (0x2d3), region = 36  ;;  %1243 = vset.pattern.permute.xlu0 (!%p166_p9), %v1335_v2  ;;  %1241 = vset.pattern.permute.xlu1 (!%p166_p9), %v1335_v2  ;;  %v1440_v5 = vld [vmem:[%s1702_s1 + $0x18] sm:$0xff] (!%p166_p9)  ;;  %v1451_v6 = vld [vmem:[%s1702_s1 + $0x28] sm:$0xff] (!%p166_p9)  ;;  %v1456_v7 = vld [vmem:[%s1702_s1 + $0x20] sm:$0xff] (!%p166_p9)  ;;  %s1164_s23 = sshll.u32 (!%p166_p9), %s1389_s19, 2  ;;  %vm472_vm0 = vcmask (!%p166_p9), 523264  }
   0xf   : > { %309 = vperm.xlu0 (!%p166_p9), %1243, %v1419_v0   ;;  %301 = vperm.xlu1 (!%p166_p9), %1241, %v1424_v1   ;;  %v1463_v8 = vld [vmem:[%s1702_s1 + $0x30] sm:$0xff] (!%p166_p9)  ;;  %v1473_v9 = vld [vmem:[%s1702_s1 + $0x38] sm:$0xff] (!%p166_p9)  ;;  %p191_p10 = scmp.lt.s32.totalorder (!%p166_p9), %s1164_s23, 7  ;;  %v1488_v12 = vshrl.u32 (!%p166_p9), %v248_v11, 7  ;;  %s187_s5 = sand.u32 (!%p166_p9), 1, %s1325_s16   ;;  %vm1085_vm1 = vcmp.lt.s32.totalorder (!%p166_p9), %v248_v11, 512 }
  0x10   : > { %517 = vmatprep.mubr.bf16.mxu0 (!%p166_p9), %v1336_v4  ;;  %590 = vmatprep.mubr.bf16.mxu1 (!%p166_p9), %v1336_v4  ;;  %s1163_s6 = sshll.u32 (!%p166_p9), %s187_s5, 2  ;;  %s1194_s7 = sshll.u32 (!%p166_p9), %s1389_s19, 6 }
  0x11   : > { %v254_v13 = vsub.s32 (!%p166_p9), 1, %v1488_v12  ;;  %v250_v16 = vsub.s32 (!%p166_p9), 0, %v1488_v12  ;;  %v262_v18 = vsub.s32 (!%p166_p9), 3, %v1488_v12  ;;  %v258_v19 = vsub.s32 (!%p166_p9), 2, %v1488_v12  ;;  %s189_s8 = scalar_lea.vmem (!%p166_p9), [#allocation2], %s1163_s6  ;;  %s1659_s12 = scalar_lea.hbm (!%p166_p9), %s1705_s4, %s1194_s7 }
  0x12   : > { %s1103_s9 = sshll.u32 (!%p166_p9), %s189_s8, 4  ;;  %s1089_s13 = scalar_lea.sflag (!%p166_p9), [#allocation3], %s187_s5  ;;  %s1661_s9 = int_to_ptr.vmem [resolvable:$true] %s1103_s9 }
  0x13   : > { %1244 = vset.pattern.permute.xlu0 (!%p166_p9), %v1336_v4  ;;  %305 = vperm.xlu1 (!%p166_p9), %1241, %v1431_v3   ;;  %s1271_s14 = scalar_lea.vmem (!%p166_p9), %s1661_s9, 64  ;;  %s1342_s19 = smov (!%p166_p9), [#allocation2]  }
  0x14   : > { %209 = vperm.xlu0 (!%p166_p9), %1244, %v1424_v1   ;;  %p1272_p11 = scmp.ne.s32.totalorder (!%p166_p9), %s1661_s9, %s1271_s14  ;;  %s1275_s20 = sshll.u32 (!%p166_p9), %s1342_s19, 4  ;;  %s1276_s20 = int_to_ptr.vmem [resolvable:$false] %s1275_s20 }
  0x15   : > { %s1713_s23 = smov (!%p191_p10, %s1164_s23), 7  ;;  %s1277_s22 = scalar_lea.vmem %s1276_s20, 128 }
  0x16   : > { %s193_s29 = scalar_lea.vmem %s1701_s0, %s1713_s23  ;;  %p1273_p12 = pnand %p1272_p11, %p1406_p5 }
  0x17   : > { %1242 = vset.pattern.permute.xlu1 %v1336_v4  ;;  %v197_v17 = vld [vmem:[%s193_s29] sm:$0xf]  ;;  %p1278_p0 = scmp.lt.s32.totalorder %s1661_s9, %s1276_s20  ;;  %p1279_p1 = scmp.lt.s32.totalorder %s1277_s22, %s1271_s14 }
  0x18   : > { %214 = vperm.xlu0 %1244, %v1431_v3   ;;  %224 = vperm.xlu1 %1242, %v1440_v5   ;;  %v1499_v20 = vrot.slane %v197_v17, %v254_v13  ;;  %v1501_v22 = vrot.slane %v197_v17, %v250_v16  ;;  %v1503_v23 = vrot.slane %v197_v17, %v262_v18  ;;  %p1274_p13 = pneg %p1273_p12 }
  0x19   : > { %v1505_v25 = vrot.slane %v197_v17, %v258_v19  ;;  %p1280_p2 = por %p1279_p1, %p1278_p0 }
  0x1b   : > { %p1281_p3 = pnand %p1280_p2, %p1274_p13 }
  0x1c   : > { %219 = vperm.xlu0 %1244, %v1419_v0   ;;  %1245 = vset.pattern.permute.xlu1 %v1335_v2 }
  0x1d   : > { %313 = vperm.xlu1 %1245, %v1440_v5  }
  0x20   : > { %234 = vperm.xlu0 %1244, %v1451_v6  }
  0x21   : > { %1246 = vset.pattern.permute.xlu1 %v1336_v4 }
  0x22   : > { %229 = vperm.xlu1 %1246, %v1456_v7  }
  0x24   : > { %239 = vperm.xlu0 %1244, %v1463_v8  }
  0x26   : > { %1247 = vset.pattern.permute.xlu1 %v1335_v2 }
  0x27   : > { %317 = vperm.xlu1 %1247, %v1456_v7  }
  0x28   : > { %1249 = vset.pattern.permute.xlu0 %v1335_v2 }
  0x29   : > { %325 = vperm.xlu0 %1249, %v1463_v8  }
  0x2b   : > { %321 = vperm.xlu1 %1247, %v1451_v6  }
  0x2d   : > { %1252 = vset.pattern.permute.xlu0 %v1337_v10 }
  0x2e   : > { %425 = vperm.xlu0 %1252, %v1431_v3  }
  0x2f   : > { %1248 = vset.pattern.permute.xlu1 %v1336_v4 }
  0x30   : > { %244 = vperm.xlu1 %1248, %v1473_v9  }
  0x32   : > { %437 = vperm.xlu0 %1252, %v1456_v7  }
  0x34   : > { %1250 = vset.pattern.permute.xlu1 %v1335_v2 }
  0x35   : > { %329 = vperm.xlu1 %1250, %v1473_v9  }
  0x36   : > { %445 = vperm.xlu0 %1252, %v1463_v8  }
  0x39   : > { %1251 = vset.pattern.permute.xlu1 %v1337_v10 }
  0x3a   : > { %421 = vperm.xlu1 %1251, %v1424_v1  }
  0x3e   : > { %429 = vperm.xlu1 %1251, %v1419_v0  }
  0x42   : > { %433 = vperm.xlu1 %1251, %v1440_v5  }
  0x46   : > { %441 = vperm.xlu1 %1251, %v1451_v6  }
  0x4a   : > { %449 = vperm.xlu1 %1251, %v1473_v9  }
  0x8e   : > { %v302_v14 = vpop.permute.xlu1 %301  ;;  %v1494_v15 = vpop.permute.xlu0 %309 }
  0x92   : > { %v306_v21 = vpop.permute.xlu1 %305 }
  0x93   : > { %v210_v24 = vpop.permute.xlu0 %209 }
  0x94   : > { %v269_v26 = vmul.f32 %v1499_v20, %v210_v24  ;;  %v268_v27 = vmul.f32 %v1501_v22, %v210_v24  ;;  %v271_v28 = vmul.f32 %v1503_v23, %v210_v24  ;;  %v270_v31 = vmul.f32 %v1505_v25, %v210_v24 }
  0x96   : > { %v333_v35 = vadd.f32 %v302_v14, %v269_v26  ;;  %v335_v37 = vadd.f32 %v302_v14, %v271_v28  ;;  %v332_v38 = vadd.f32 %v302_v14, %v268_v27  ;;  %v334_v49 = vadd.f32 %v302_v14, %v270_v31 }
  0x97   : > { %v215_v29 = vpop.permute.xlu0 %214  ;;  %v225_v30 = vpop.permute.xlu1 %224 }
  0x98   : > { %v272_v32 = vmul.f32 %v1501_v22, %v215_v29  ;;  %v274_v33 = vmul.f32 %v1505_v25, %v215_v29  ;;  %v273_v34 = vmul.f32 %v1499_v20, %v215_v29  ;;  %v275_v36 = vmul.f32 %v1503_v23, %v215_v29 }
  0x99   : > { %v281_v40 = vmul.f32 %v1499_v20, %v225_v30  ;;  %v283_v41 = vmul.f32 %v1503_v23, %v225_v30  ;;  %v280_v45 = vmul.f32 %v1501_v22, %v225_v30  ;;  %v282_v50 = vmul.f32 %v1505_v25, %v225_v30 }
  0x9a   : > { %v336_v39 = vadd.f32 %v306_v21, %v272_v32  ;;  %v337_v43 = vadd.f32 %v306_v21, %v273_v34  ;;  %v338_v44 = vadd.f32 %v306_v21, %v274_v33  ;;  %v365_v53 = vmax.f32 %v333_v35, 0.0 }
  0x9b   : > { %v220_v42 = vpop.permute.xlu0 %219  ;;  %v339_v55 = vadd.f32 %v306_v21, %v275_v36  ;;  %v364_v59 = vmax.f32 %v332_v38, 0.0  ;;  %v367_v63 = vmax.f32 %v335_v37, 0.0  ;;  %v366_v2 = vmax.f32 %v334_v49, 0.0 }
  0x9c   : > { %v277_v46 = vmul.f32 %v1499_v20, %v220_v42  ;;  %v279_v47 = vmul.f32 %v1503_v23, %v220_v42  ;;  %v314_v48 = vpop.permute.xlu1 %313  ;;  %v369_v54 = vmax.f32 %v337_v43, 0.0  ;;  %v368_v56 = vmax.f32 %v336_v39, 0.0 }
  0x9d   : > { %v345_v51 = vadd.f32 %v314_v48, %v281_v40  ;;  %v347_v52 = vadd.f32 %v314_v48, %v283_v41  ;;  %v370_v57 = vmax.f32 %v338_v44, 0.0  ;;  %v276_v58 = vmul.f32 %v1501_v22, %v220_v42 }
  0x9e   : > { %v341_v60 = vadd.f32 %v1494_v15, %v277_v46  ;;  %v343_v61 = vadd.f32 %v1494_v15, %v279_v47  ;;  %v344_v62 = vadd.f32 %v314_v48, %v280_v45  ;;  %v405_v13 = vpack.c.bf16 %v369_v54, %v365_v53 }
  0x9f   : > { %v377_v10 = vmax.f32 %v345_v51, 0.0  ;;  %v371_v14 = vmax.f32 %v339_v55, 0.0  ;;  %v404_v17 = vpack.c.bf16 %v368_v56, %v364_v59  ;;  %v379_v18 = vmax.f32 %v347_v52, 0.0  ;;  %v235_v24 = vpop.permute.xlu0 %234 }
  0xa0   : > { %v278_v19 = vmul.f32 %v1505_v25, %v220_v42  ;;  %v346_v21 = vadd.f32 %v314_v48, %v282_v50  ;;  %v406_v26 = vpack.c.bf16 %v370_v57, %v366_v2  ;;  %485 = vmatprep.subr.bf16.mxu0 %v405_v13  ;;  %v373_v28 = vmax.f32 %v341_v60, 0.0 }
  0xa1   : > { %v230_v16 = vpop.permute.xlu1 %229  ;;  %v407_v27 = vpack.c.bf16 %v371_v14, %v367_v63  ;;  %v375_v29 = vmax.f32 %v343_v61, 0.0  ;;  %v340_v30 = vadd.f32 %v1494_v15, %v276_v58  ;;  %486 = vmatpush1.bf16.msra.mxu0 %v404_v17  ;;  %v376_v36 = vmax.f32 %v344_v62, 0.0 }
  0xa2   : > { %v284_v31 = vmul.f32 %v1501_v22, %v230_v16  ;;  %v285_v32 = vmul.f32 %v1499_v20, %v230_v16  ;;  %v409_v33 = vpack.c.bf16 %v377_v10, %v373_v28  ;;  %v286_v37 = vmul.f32 %v1505_v25, %v230_v16 }
  0xa3   : > { %558 = vmatprep.subr.bf16.mxu1 %v407_v27  ;;  %v411_v34 = vpack.c.bf16 %v379_v18, %v375_v29  ;;  %v372_v35 = vmax.f32 %v340_v30, 0.0  ;;  %v287_v38 = vmul.f32 %v1503_v23, %v230_v16  ;;  %v342_v39 = vadd.f32 %v1494_v15, %v278_v19  ;;  %v240_v44 = vpop.permute.xlu0 %239 }
  0xa4   : > { %559 = vmatpush1.bf16.msra.mxu1 %v406_v26  ;;  %v378_v40 = vmax.f32 %v346_v21, 0.0  ;;  %487 = vmatprep.subr.bf16.mxu0 %v409_v33  ;;  %v288_v49 = vmul.f32 %v1501_v22, %v235_v24  ;;  %v289_v50 = vmul.f32 %v1499_v20, %v235_v24  ;;  %v290_v51 = vmul.f32 %v1505_v25, %v235_v24 }
  0xa5   : > { %560 = vmatprep.subr.bf16.mxu1 %v411_v34  ;;  %v408_v42 = vpack.c.bf16 %v376_v36, %v372_v35  ;;  %v374_v45 = vmax.f32 %v342_v39, 0.0  ;;  %v291_v52 = vmul.f32 %v1503_v23, %v235_v24  ;;  %v292_v13 = vmul.f32 %v1501_v22, %v240_v44 }
  0xa6   : > { %v318_v41 = vpop.permute.xlu1 %317  ;;  %v293_v24 = vmul.f32 %v1499_v20, %v240_v44  ;;  %v294_v26 = vmul.f32 %v1505_v25, %v240_v44  ;;  %v295_v27 = vmul.f32 %v1503_v23, %v240_v44 }
  0xa7   : > { %v348_v43 = vadd.f32 %v318_v41, %v284_v31  ;;  %v349_v46 = vadd.f32 %v318_v41, %v285_v32  ;;  %v350_v47 = vadd.f32 %v318_v41, %v286_v37  ;;  %v351_v48 = vadd.f32 %v318_v41, %v287_v38  ;;  %488 = vmatpush1.bf16.msra.mxu0 %v408_v42 }
  0xa8   : > { %v410_v15 = vpack.c.bf16 %v378_v40, %v374_v45  ;;  %v326_v14 = vpop.permute.xlu0 %325 }
  0xa9   : > { %v381_v58 = vmax.f32 %v349_v46, 0.0  ;;  %v383_v59 = vmax.f32 %v351_v48, 0.0  ;;  %v380_v60 = vmax.f32 %v348_v43, 0.0  ;;  %v382_v61 = vmax.f32 %v350_v47, 0.0 }
  0xaa   : > { %v322_v53 = vpop.permute.xlu1 %321  ;;  %561 = vmatpush1.bf16.msra.mxu1 %v410_v15  ;;  %v356_v28 = vadd.f32 %v326_v14, %v292_v13  ;;  %v357_v29 = vadd.f32 %v326_v14, %v293_v24  ;;  %v358_v30 = vadd.f32 %v326_v14, %v294_v26  ;;  %v359_v31 = vadd.f32 %v326_v14, %v295_v27 }
  0xab   : > { %v352_v54 = vadd.f32 %v322_v53, %v288_v49  ;;  %v353_v55 = vadd.f32 %v322_v53, %v289_v50  ;;  %v354_v56 = vadd.f32 %v322_v53, %v290_v51  ;;  %v355_v57 = vadd.f32 %v322_v53, %v291_v52  ;;  %v1265_v51 = vld [vmem:[%s1703_s2 + $0x10] sm:$0xff]   ;;  %v1266_v52 = vld [vmem:[%s1703_s2 + $0x18] sm:$0xff]  }
  0xac   : > { %v389_v41 = vmax.f32 %v357_v29, 0.0  ;;  %v391_v42 = vmax.f32 %v359_v31, 0.0  ;;  %v388_v43 = vmax.f32 %v356_v28, 0.0  ;;  %v390_v44 = vmax.f32 %v358_v30, 0.0 }
  0xad   : > { %v385_v62 = vmax.f32 %v353_v55, 0.0  ;;  %v387_v63 = vmax.f32 %v355_v57, 0.0  ;;  %v384_v2 = vmax.f32 %v352_v54, 0.0  ;;  %v386_v10 = vmax.f32 %v354_v56, 0.0 }
  0xae   : > { %v1338_v15 = vmov 3   ;;  %v1339_v53 = vmov 4  }
  0xaf   : > { %v245_v16 = vpop.permute.xlu1 %244  ;;  %v413_v17 = vpack.c.bf16 %v385_v62, %v381_v58  ;;  %v415_v18 = vpack.c.bf16 %v387_v63, %v383_v59  ;;  %v412_v19 = vpack.c.bf16 %v384_v2, %v380_v60  ;;  %v414_v21 = vpack.c.bf16 %v386_v10, %v382_v61  ;;  %1253 = vset.pattern.permute.xlu1 %v1338_v15 }
  0xb0   : > { %v296_v32 = vmul.f32 %v1501_v22, %v245_v16  ;;  %v297_v33 = vmul.f32 %v1499_v20, %v245_v16  ;;  %v298_v34 = vmul.f32 %v1505_v25, %v245_v16  ;;  %v299_v35 = vmul.f32 %v1503_v23, %v245_v16  ;;  %v1263_v23 = vld [vmem:[%s1703_s2] sm:$0xff]   ;;  %v1264_v25 = vld [vmem:[%s1703_s2 + $0x8] sm:$0xff]   ;;  %1255 = vset.pattern.permute.xlu0 %v1339_v53 }
  0xb1   : > { %489 = vmatprep.subr.bf16.mxu0 %v413_v17  ;;  %562 = vmatprep.subr.bf16.mxu1 %v415_v18 }
  0xb2   : > { %490 = vmatpush1.bf16.msra.mxu0 %v412_v19  ;;  %563 = vmatpush1.bf16.msra.mxu1 %v414_v21 }
  0xb3   : > { %692 = vperm.xlu1 %1253, %v1431_v3   ;;  %934 = vperm.xlu0 %1255, %v1431_v3   ;;  %v1340_v3 = vmov 5  }
  0xb4   : > { %v330_v36 = vpop.permute.xlu1 %329 }
  0xb5   : > { %v360_v37 = vadd.f32 %v330_v36, %v296_v32  ;;  %v361_v38 = vadd.f32 %v330_v36, %v297_v33  ;;  %v362_v39 = vadd.f32 %v330_v36, %v298_v34  ;;  %v363_v40 = vadd.f32 %v330_v36, %v299_v35 }
  0xb7   : > { %v393_v45 = vmax.f32 %v361_v38, 0.0  ;;  %v395_v46 = vmax.f32 %v363_v40, 0.0  ;;  %v392_v47 = vmax.f32 %v360_v37, 0.0  ;;  %v394_v48 = vmax.f32 %v362_v39, 0.0  ;;  %696 = vperm.xlu1 %1253, %v1419_v0   ;;  %1256 = vset.pattern.permute.xlu0 %v1338_v15 }
  0xb8   : > { %688 = vperm.xlu0 %1256, %v1424_v1  }
  0xb9   : > { %v417_v22 = vpack.c.bf16 %v393_v45, %v389_v41  ;;  %v419_v49 = vpack.c.bf16 %v395_v46, %v391_v42  ;;  %v416_v20 = vpack.c.bf16 %v392_v47, %v388_v43  ;;  %v418_v50 = vpack.c.bf16 %v394_v48, %v390_v44 }
  0xbb   : > { %491 = vmatprep.subr.bf16.mxu0 %v417_v22  ;;  %564 = vmatprep.subr.bf16.mxu1 %v419_v49 }
  0xbc   : > { %492 = vmatpush1.bf16.msra.mxu0 %v416_v20  ;;  %565 = vmatpush1.bf16.msra.mxu1 %v418_v50 }
  0xbd   : > { %1254 = vset.pattern.permute.xlu1 %v1339_v53  ;;  %700 = vperm.xlu0 %1256, %v1440_v5  }
  0xbe   : > { %930 = vperm.xlu1 %1254, %v1424_v1   ;;  %v206_v1 = vld [vmem:[%s1702_s1] sm:$0x1] }
  0xbf   : > { %1169 = vmatmul.mubr.msk.bf16.vlgmr.msra.gmra.mrb[0].mxu0 %vm472_vm0, %v1263_v23  ;;  %1173 = vmatmul.mubr.msk.bf16.vlgmr.msra.gmra.mrb[0].mxu1 %vm472_vm0, %v1263_v23 }
  0xc0   : > { %527 = vmatprep.mubr.bf16.mxu0 %v1336_v4  ;;  %600 = vmatprep.mubr.bf16.mxu1 %v1336_v4 }
  0xc1   : > { %708 = vperm.xlu0 %1256, %v1451_v6  }
  0xc2   : > { %1257 = vset.pattern.permute.xlu1 %v1338_v15 }
  0xc3   : > { %704 = vperm.xlu1 %1257, %v1456_v7  }
  0xc5   : > { %1260 = vset.pattern.permute.xlu0 %v1339_v53 }
  0xc6   : > { %946 = vperm.xlu0 %1260, %v1456_v7  }
  0xc7   : > { %1170 = vmatmul.mubr.msk.bf16.gmra.mrb[4].mxu0 %vm472_vm0, %v1264_v25  ;;  %1174 = vmatmul.mubr.msk.bf16.gmra.mrb[4].mxu1 %vm472_vm0, %v1264_v25 }
  0xc8   : > { %537 = vmatprep.mubr.bf16.mxu0 %v1336_v4  ;;  %610 = vmatprep.mubr.bf16.mxu1 %v1336_v4 }
  0xc9   : > { %1258 = vset.pattern.permute.xlu1 %v1339_v53 }
  0xca   : > { %938 = vperm.xlu1 %1258, %v1419_v0   ;;  %954 = vperm.xlu0 %1260, %v1463_v8   ;;  %v422_v0 = vpop.permute.xlu1 %421 }
  0xce   : > { %942 = vperm.xlu1 %1258, %v1440_v5   ;;  %1262 = vset.pattern.permute.xlu0 %v1340_v3  ;;  %v430_v7 = vpop.permute.xlu1 %429  ;;  %v426_v5 = vpop.permute.xlu0 %425 }
  0xcf   : > { %1171 = vmatmul.mubr.msk.bf16.gmra.mrb[8].mxu0 %vm472_vm0, %v1265_v51  ;;  %1175 = vmatmul.mubr.msk.bf16.gmra.mrb[8].mxu1 %vm472_vm0, %v1265_v51 }
  0xd0   : > { %547 = vmatprep.mubr.bf16.mxu0 %v1336_v4  ;;  %620 = vmatprep.mubr.bf16.mxu1 %v1336_v4 }
  0xd1   : > { %1047 = vperm.xlu0 %1262, %v206_v1  }
  0xd2   : > { %1259 = vset.pattern.permute.xlu1 %v1338_v15  ;;  %v434_v27 = vpop.permute.xlu1 %433 }
  0xd3   : > { %712 = vperm.xlu1 %1259, %v1463_v8  }
  0xd6   : > { %v442_v15 = vpop.permute.xlu1 %441 }
  0xd7   : > { %1172 = vmatmul.mubr.msk.bf16.gmra.mrb[12].mxu0 %vm472_vm0, %v1266_v52  ;;  %1176 = vmatmul.mubr.msk.bf16.gmra.mrb[12].mxu1 %vm472_vm0, %v1266_v52  ;;  %v438_v52 = vpop.permute.xlu0 %437 }
  0xd8   : > { %783 = vmatprep.mubr.bf16.mxu0 %v1336_v4  ;;  %856 = vmatprep.mubr.bf16.mxu1 %v1336_v4 }
  0xd9   : > { %716 = vperm.xlu1 %1259, %v1473_v9  }
  0xdd   : > { %1261 = vset.pattern.permute.xlu1 %v1339_v53 }
  0xde   : > { %950 = vperm.xlu1 %1261, %v1451_v6  }
  0xe2   : > { %958 = vperm.xlu1 %1261, %v1473_v9  }
 0x192   : > { %v519_v54 = vpop.f32.mrb[0].mxu0  ;;  %v592_v55 = vpop.f32.mrb[0].mxu1 }
 0x193   : > { %v520_v56 = vadd.f32 %v519_v54, %v422_v0  ;;  %v593_v57 = vadd.f32 %v592_v55, %v422_v0  ;;  %v521_v58 = vpop.f32.mrb[1].mxu0  ;;  %v594_v59 = vpop.f32.mrb[1].mxu1 }
 0x194   : > { %v522_v60 = vadd.f32 %v521_v58, %v422_v0  ;;  %v595_v61 = vadd.f32 %v594_v59, %v422_v0  ;;  %v523_v62 = vpop.f32.mrb[2].mxu0  ;;  %v596_v8 = vpop.f32.mrb[2].mxu1 }
 0x195   : > { %v524_v63 = vadd.f32 %v523_v62, %v426_v5  ;;  %v597_v2 = vadd.f32 %v596_v8, %v426_v5  ;;  %v525_v10 = vpop.f32.mrb[3].mxu0  ;;  %v598_v13 = vpop.f32.mrb[3].mxu1  ;;  %v631_v9 = vmax.f32 %v520_v56, 0.0  ;;  %v633_v16 = vmax.f32 %v593_v57, 0.0 }
 0x196   : > { %v526_v6 = vadd.f32 %v525_v10, %v426_v5  ;;  %v599_v14 = vadd.f32 %v598_v13, %v426_v5  ;;  %v632_v19 = vmax.f32 %v522_v60, 0.0  ;;  %v634_v21 = vmax.f32 %v595_v61, 0.0 }
 0x197   : > { %v635_v17 = vmax.f32 %v524_v63, 0.0  ;;  %v637_v18 = vmax.f32 %v597_v2, 0.0 }
 0x198   : > { %v636_v24 = vmax.f32 %v526_v6, 0.0  ;;  %v638_v26 = vmax.f32 %v599_v14, 0.0 }
 0x199   : > { %v671_v28 = vpack.c.bf16 %v635_v17, %v631_v9  ;;  %v673_v29 = vpack.c.bf16 %v637_v18, %v633_v16 }
 0x19a   : > { %v672_v30 = vpack.c.bf16 %v636_v24, %v632_v19  ;;  %v674_v31 = vpack.c.bf16 %v638_v26, %v634_v21  ;;  %v529_v32 = vpop.f32.mrb[4].mxu0  ;;  %v602_v33 = vpop.f32.mrb[4].mxu1 }
 0x19b   : > { %v530_v34 = vadd.f32 %v529_v32, %v430_v7  ;;  %v603_v35 = vadd.f32 %v602_v33, %v430_v7  ;;  %v531_v36 = vpop.f32.mrb[5].mxu0  ;;  %v604_v37 = vpop.f32.mrb[5].mxu1 }
 0x19c   : > { %v532_v38 = vadd.f32 %v531_v36, %v430_v7  ;;  %v605_v39 = vadd.f32 %v604_v37, %v430_v7  ;;  %v533_v40 = vpop.f32.mrb[6].mxu0  ;;  %v606_v41 = vpop.f32.mrb[6].mxu1  ;;  %751 = vmatprep.subr.bf16.mxu0 %v672_v30  ;;  %824 = vmatprep.subr.bf16.mxu1 %v674_v31 }
 0x19d   : > { %v534_v42 = vadd.f32 %v533_v40, %v434_v27  ;;  %v607_v43 = vadd.f32 %v606_v41, %v434_v27  ;;  %v535_v44 = vpop.f32.mrb[7].mxu0  ;;  %v608_v45 = vpop.f32.mrb[7].mxu1  ;;  %752 = vmatpush1.bf16.msra.mxu0 %v671_v28  ;;  %825 = vmatpush1.bf16.msra.mxu1 %v673_v29  ;;  %v639_v48 = vmax.f32 %v530_v34, 0.0  ;;  %v641_v22 = vmax.f32 %v603_v35, 0.0 }
 0x19e   : > { %v536_v46 = vadd.f32 %v535_v44, %v434_v27  ;;  %v609_v47 = vadd.f32 %v608_v45, %v434_v27  ;;  %v640_v50 = vmax.f32 %v532_v38, 0.0  ;;  %v642_v23 = vmax.f32 %v605_v39, 0.0  ;;  %v446_v24 = vpop.permute.xlu0 %445  ;;  %v450_v26 = vpop.permute.xlu1 %449 }
 0x19f   : > { %v643_v49 = vmax.f32 %v534_v42, 0.0  ;;  %v645_v20 = vmax.f32 %v607_v43, 0.0 }
 0x1a0   : > { %v644_v25 = vmax.f32 %v536_v46, 0.0  ;;  %v646_v51 = vmax.f32 %v609_v47, 0.0 }
 0x1a1   : > { %v675_v53 = vpack.c.bf16 %v643_v49, %v639_v48  ;;  %v677_v1 = vpack.c.bf16 %v645_v20, %v641_v22 }
 0x1a2   : > { %v676_v3 = vpack.c.bf16 %v644_v25, %v640_v50  ;;  %v678_v0 = vpack.c.bf16 %v646_v51, %v642_v23  ;;  %v539_v7 = vpop.f32.mrb[8].mxu0  ;;  %v612_v5 = vpop.f32.mrb[8].mxu1 }
 0x1a3   : > { %v540_v54 = vadd.f32 %v539_v7, %v438_v52  ;;  %v613_v55 = vadd.f32 %v612_v5, %v438_v52  ;;  %v541_v56 = vpop.f32.mrb[9].mxu0  ;;  %v614_v57 = vpop.f32.mrb[9].mxu1  ;;  %v1270_v7 = vld [vmem:[%s1704_s3 + $0x18] sm:$0xff]  }
 0x1a4   : > { %v542_v58 = vadd.f32 %v541_v56, %v438_v52  ;;  %v615_v59 = vadd.f32 %v614_v57, %v438_v52  ;;  %v543_v60 = vpop.f32.mrb[10].mxu0  ;;  %v616_v61 = vpop.f32.mrb[10].mxu1  ;;  %753 = vmatprep.subr.bf16.mxu0 %v676_v3  ;;  %826 = vmatprep.subr.bf16.mxu1 %v678_v0  ;;  %v1268_v3 = vld [vmem:[%s1704_s3 + $0x8] sm:$0xff]   ;;  %v1269_v0 = vld [vmem:[%s1704_s3 + $0x10] sm:$0xff]  }
 0x1a5   : > { %v544_v62 = vadd.f32 %v543_v60, %v442_v15  ;;  %v617_v8 = vadd.f32 %v616_v61, %v442_v15  ;;  %v545_v63 = vpop.f32.mrb[11].mxu0  ;;  %v618_v2 = vpop.f32.mrb[11].mxu1  ;;  %754 = vmatpush1.bf16.msra.mxu0 %v675_v53  ;;  %827 = vmatpush1.bf16.msra.mxu1 %v677_v1  ;;  %v647_v6 = vmax.f32 %v540_v54, 0.0  ;;  %v649_v14 = vmax.f32 %v613_v55, 0.0  ;;  %v1267_v1 = vld [vmem:[%s1704_s3] sm:$0xff]  }
 0x1a6   : > { %v546_v10 = vadd.f32 %v545_v63, %v442_v15  ;;  %v619_v13 = vadd.f32 %v618_v2, %v442_v15  ;;  %v648_v17 = vmax.f32 %v542_v58, 0.0  ;;  %v650_v18 = vmax.f32 %v615_v59, 0.0  ;;  %v693_v5 = vpop.permute.xlu1 %692  ;;  %v935_v57 = vpop.permute.xlu0 %934 }
 0x1a7   : > { %v651_v9 = vmax.f32 %v544_v62, 0.0  ;;  %v653_v16 = vmax.f32 %v617_v8, 0.0 }
 0x1a8   : > { %v652_v19 = vmax.f32 %v546_v10, 0.0  ;;  %v654_v21 = vmax.f32 %v619_v13, 0.0 }
 0x1a9   : > { %v679_v27 = vpack.c.bf16 %v651_v9, %v647_v6  ;;  %v681_v28 = vpack.c.bf16 %v653_v16, %v649_v14 }
 0x1aa   : > { %v680_v29 = vpack.c.bf16 %v652_v19, %v648_v17  ;;  %v682_v30 = vpack.c.bf16 %v654_v21, %v650_v18  ;;  %v549_v31 = vpop.f32.mrb[12].mxu0  ;;  %v622_v32 = vpop.f32.mrb[12].mxu1 }
 0x1ab   : > { %v550_v33 = vadd.f32 %v549_v31, %v446_v24  ;;  %v623_v34 = vadd.f32 %v622_v32, %v446_v24  ;;  %v551_v35 = vpop.f32.mrb[13].mxu0  ;;  %v624_v36 = vpop.f32.mrb[13].mxu1 }
 0x1ac   : > { %v552_v37 = vadd.f32 %v551_v35, %v446_v24  ;;  %v625_v38 = vadd.f32 %v624_v36, %v446_v24  ;;  %v553_v39 = vpop.f32.mrb[14].mxu0  ;;  %v626_v40 = vpop.f32.mrb[14].mxu1  ;;  %755 = vmatprep.subr.bf16.mxu0 %v680_v29  ;;  %828 = vmatprep.subr.bf16.mxu1 %v682_v30 }
 0x1ad   : > { %v554_v41 = vadd.f32 %v553_v39, %v450_v26  ;;  %v627_v42 = vadd.f32 %v626_v40, %v450_v26  ;;  %v555_v43 = vpop.f32.mrb[15].mxu0  ;;  %v628_v44 = vpop.f32.mrb[15].mxu1  ;;  %756 = vmatpush1.bf16.msra.mxu0 %v679_v27  ;;  %829 = vmatpush1.bf16.msra.mxu1 %v681_v28  ;;  %v655_v47 = vmax.f32 %v550_v33, 0.0  ;;  %v657_v48 = vmax.f32 %v623_v34, 0.0 }
 0x1ae   : > { %v556_v45 = vadd.f32 %v555_v43, %v450_v26  ;;  %v629_v46 = vadd.f32 %v628_v44, %v450_v26  ;;  %v656_v20 = vmax.f32 %v552_v37, 0.0  ;;  %v658_v50 = vmax.f32 %v625_v38, 0.0  ;;  %v697_v54 = vpop.permute.xlu1 %696  ;;  %v689_v59 = vpop.permute.xlu0 %688 }
 0x1af   : > { %v659_v22 = vmax.f32 %v554_v41, 0.0  ;;  %v661_v49 = vmax.f32 %v627_v42, 0.0 }
 0x1b0   : > { %v660_v23 = vmax.f32 %v556_v45, 0.0  ;;  %v662_v25 = vmax.f32 %v629_v46, 0.0 }
 0x1b1   : > { %v683_v51 = vpack.c.bf16 %v659_v22, %v655_v47  ;;  %v685_v52 = vpack.c.bf16 %v661_v49, %v657_v48 }
 0x1b2   : > { %v684_v15 = vpack.c.bf16 %v660_v23, %v656_v20  ;;  %v686_v53 = vpack.c.bf16 %v662_v25, %v658_v50  ;;  %v931_v55 = vpop.permute.xlu1 %930  ;;  %v701_v60 = vpop.permute.xlu0 %700 }
 0x1b4   : > { %757 = vmatprep.subr.bf16.mxu0 %v684_v15  ;;  %830 = vmatprep.subr.bf16.mxu1 %v686_v53 }
 0x1b5   : > { %758 = vmatpush1.bf16.msra.mxu0 %v683_v51  ;;  %831 = vmatpush1.bf16.msra.mxu1 %v685_v52 }
 0x1b6   : > { %v1616_v56 = vpop.permute.xlu1 %704  ;;  %v1624_v39 = vpop.permute.xlu0 %708 }
 0x1b8   : > { %1181 = vmatmul.mubr.msk.bf16.vlgmr.msra.gmra.mrb[16].mxu0 %vm472_vm0, %v1267_v1  ;;  %1185 = vmatmul.mubr.msk.bf16.vlgmr.msra.gmra.mrb[16].mxu1 %vm472_vm0, %v1267_v1 }
 0x1b9   : > { %793 = vmatprep.mubr.bf16.mxu0 %v1336_v4  ;;  %866 = vmatprep.mubr.bf16.mxu1 %v1336_v4 }
 0x1ba   : > { %v1618_v58 = vpop.permute.xlu1 %938 }
 0x1be   : > { %v1620_v61 = vpop.permute.xlu1 %942 }
 0x1c0   : > { %1182 = vmatmul.mubr.msk.bf16.gmra.mrb[20].mxu0 %vm472_vm0, %v1268_v3  ;;  %1186 = vmatmul.mubr.msk.bf16.gmra.mrb[20].mxu1 %vm472_vm0, %v1268_v3 }
 0x1c1   : > { %803 = vmatprep.mubr.bf16.mxu0 %v1336_v4  ;;  %876 = vmatprep.mubr.bf16.mxu1 %v1336_v4 }
 0x1c2   : > { %v1622_v38 = vpop.permute.xlu1 %712 }
 0x1c8   : > { %1183 = vmatmul.mubr.msk.bf16.gmra.mrb[24].mxu0 %vm472_vm0, %v1269_v0  ;;  %1187 = vmatmul.mubr.msk.bf16.gmra.mrb[24].mxu1 %vm472_vm0, %v1269_v0 }
 0x1c9   : > { %813 = vmatprep.mubr.bf16.mxu0 %v1336_v4  ;;  %886 = vmatprep.mubr.bf16.mxu1 %v1336_v4 }
 0x1d0   : > { %1184 = vmatmul.mubr.msk.bf16.gmra.mrb[28].mxu0 %vm472_vm0, %v1270_v7  ;;  %1188 = vmatmul.mubr.msk.bf16.gmra.mrb[28].mxu1 %vm472_vm0, %v1270_v7 }
 0x28b   : > { %v785_v4 = vpop.f32.mrb[16].mxu0  ;;  %v858_v62 = vpop.f32.mrb[16].mxu1 }
 0x28c   : > { %v786_v8 = vadd.f32 %v785_v4, %v689_v59  ;;  %v859_v63 = vadd.f32 %v858_v62, %v689_v59  ;;  %v787_v2 = vpop.f32.mrb[17].mxu0  ;;  %v860_v10 = vpop.f32.mrb[17].mxu1 }
 0x28d   : > { %v788_v13 = vadd.f32 %v787_v2, %v689_v59  ;;  %v861_v6 = vadd.f32 %v860_v10, %v689_v59  ;;  %v789_v14 = vpop.f32.mrb[18].mxu0  ;;  %v862_v9 = vpop.f32.mrb[18].mxu1 }
 0x28e   : > { %v897_v16 = vmax.f32 %v786_v8, 0.0  ;;  %v899_v17 = vmax.f32 %v859_v63, 0.0  ;;  %v790_v18 = vadd.f32 %v789_v14, %v693_v5  ;;  %v863_v19 = vadd.f32 %v862_v9, %v693_v5  ;;  %v791_v21 = vpop.f32.mrb[19].mxu0  ;;  %v864_v24 = vpop.f32.mrb[19].mxu1 }
 0x28f   : > { %v898_v26 = vmax.f32 %v788_v13, 0.0  ;;  %v900_v27 = vmax.f32 %v861_v6, 0.0  ;;  %v792_v28 = vadd.f32 %v791_v21, %v693_v5  ;;  %v865_v29 = vadd.f32 %v864_v24, %v693_v5  ;;  %v1630_v14 = vpop.permute.xlu1 %716 }
 0x290   : > { %v901_v30 = vmax.f32 %v790_v18, 0.0  ;;  %v903_v31 = vmax.f32 %v863_v19, 0.0  ;;  %v961_v34 = vmul.f32 %v931_v55, %v897_v16  ;;  %v963_v35 = vmul.f32 %v931_v55, %v899_v17  ;;  %v947_v18 = vpop.permute.xlu0 %946 }
 0x291   : > { %v902_v32 = vmax.f32 %v792_v28, 0.0  ;;  %v904_v33 = vmax.f32 %v865_v29, 0.0  ;;  %v962_v40 = vmul.f32 %v931_v55, %v898_v26  ;;  %v964_v41 = vmul.f32 %v931_v55, %v900_v27 }
 0x292   : > { %v965_v36 = vmul.f32 %v935_v57, %v901_v30  ;;  %v967_v37 = vmul.f32 %v935_v57, %v903_v31 }
 0x293   : > { %v966_v42 = vmul.f32 %v935_v57, %v902_v32  ;;  %v968_v43 = vmul.f32 %v935_v57, %v904_v33  ;;  %v795_v44 = vpop.f32.mrb[20].mxu0  ;;  %v868_v45 = vpop.f32.mrb[20].mxu1 }
 0x294   : > { %v993_v46 = vadd.f32 %v965_v36, %v961_v34  ;;  %v1019_v47 = vadd.f32 %v967_v37, %v963_v35  ;;  %v796_v48 = vadd.f32 %v795_v44, %v697_v54  ;;  %v869_v22 = vadd.f32 %v868_v45, %v697_v54  ;;  %v797_v49 = vpop.f32.mrb[21].mxu0  ;;  %v870_v20 = vpop.f32.mrb[21].mxu1 }
 0x295   : > { %v1006_v50 = vadd.f32 %v966_v42, %v962_v40  ;;  %v1032_v23 = vadd.f32 %v968_v43, %v964_v41  ;;  %v798_v25 = vadd.f32 %v797_v49, %v697_v54  ;;  %v871_v51 = vadd.f32 %v870_v20, %v697_v54  ;;  %v799_v52 = vpop.f32.mrb[22].mxu0  ;;  %v872_v15 = vpop.f32.mrb[22].mxu1 }
 0x296   : > { %v905_v53 = vmax.f32 %v796_v48, 0.0  ;;  %v907_v1 = vmax.f32 %v869_v22, 0.0  ;;  %v800_v3 = vadd.f32 %v799_v52, %v701_v60  ;;  %v873_v0 = vadd.f32 %v872_v15, %v701_v60  ;;  %v801_v7 = vpop.f32.mrb[23].mxu0  ;;  %v874_v5 = vpop.f32.mrb[23].mxu1 }
 0x297   : > { %v906_v55 = vmax.f32 %v798_v25, 0.0  ;;  %v908_v57 = vmax.f32 %v871_v51, 0.0  ;;  %v802_v59 = vadd.f32 %v801_v7, %v701_v60  ;;  %v875_v4 = vadd.f32 %v874_v5, %v701_v60  ;;  %v951_v20 = vpop.permute.xlu1 %950 }
 0x298   : > { %v969_v62 = vmul.f32 %v1618_v58, %v905_v53  ;;  %v971_v8 = vmul.f32 %v1618_v58, %v907_v1  ;;  %v909_v63 = vmax.f32 %v800_v3, 0.0  ;;  %v911_v2 = vmax.f32 %v873_v0, 0.0 }
 0x299   : > { %v970_v54 = vmul.f32 %v1618_v58, %v906_v55  ;;  %v972_v10 = vmul.f32 %v1618_v58, %v908_v57  ;;  %v910_v13 = vmax.f32 %v802_v59, 0.0  ;;  %v912_v6 = vmax.f32 %v875_v4, 0.0 }
 0x29a   : > { %v994_v9 = vadd.f32 %v993_v46, %v969_v62  ;;  %v1020_v16 = vadd.f32 %v1019_v47, %v971_v8  ;;  %v973_v17 = vmul.f32 %v1620_v61, %v909_v63  ;;  %v975_v60 = vmul.f32 %v1620_v61, %v911_v2 }
 0x29b   : > { %v1007_v19 = vadd.f32 %v1006_v50, %v970_v54  ;;  %v1033_v21 = vadd.f32 %v1032_v23, %v972_v10  ;;  %v974_v24 = vmul.f32 %v1620_v61, %v910_v13  ;;  %v976_v26 = vmul.f32 %v1620_v61, %v912_v6  ;;  %v805_v27 = vpop.f32.mrb[24].mxu0  ;;  %v878_v28 = vpop.f32.mrb[24].mxu1 }
 0x29c   : > { %v995_v58 = vadd.f32 %v994_v9, %v973_v17  ;;  %v1021_v29 = vadd.f32 %v1020_v16, %v975_v60  ;;  %v806_v30 = vadd.f32 %v805_v27, %v1616_v56  ;;  %v879_v31 = vadd.f32 %v878_v28, %v1616_v56  ;;  %v807_v32 = vpop.f32.mrb[25].mxu0  ;;  %v880_v33 = vpop.f32.mrb[25].mxu1 }
 0x29d   : > { %v1008_v34 = vadd.f32 %v1007_v19, %v974_v24  ;;  %v1034_v35 = vadd.f32 %v1033_v21, %v976_v26  ;;  %v808_v36 = vadd.f32 %v807_v32, %v1616_v56  ;;  %v881_v37 = vadd.f32 %v880_v33, %v1616_v56  ;;  %v809_v40 = vpop.f32.mrb[26].mxu0  ;;  %v882_v41 = vpop.f32.mrb[26].mxu1 }
 0x29e   : > { %v913_v42 = vmax.f32 %v806_v30, 0.0  ;;  %v915_v61 = vmax.f32 %v879_v31, 0.0  ;;  %v810_v43 = vadd.f32 %v809_v40, %v1624_v39  ;;  %v883_v44 = vadd.f32 %v882_v41, %v1624_v39  ;;  %v811_v45 = vpop.f32.mrb[27].mxu0  ;;  %v884_v46 = vpop.f32.mrb[27].mxu1 }
 0x29f   : > { %v914_v47 = vmax.f32 %v808_v36, 0.0  ;;  %v916_v48 = vmax.f32 %v881_v37, 0.0  ;;  %v812_v22 = vadd.f32 %v811_v45, %v1624_v39  ;;  %v885_v49 = vadd.f32 %v884_v46, %v1624_v39  ;;  %v955_v31 = vpop.permute.xlu0 %954  ;;  %v959_v41 = vpop.permute.xlu1 %958 }
 0x2a0   : > { %v917_v50 = vmax.f32 %v810_v43, 0.0  ;;  %v919_v23 = vmax.f32 %v883_v44, 0.0  ;;  %v977_v56 = vmul.f32 %v947_v18, %v913_v42  ;;  %v979_v25 = vmul.f32 %v947_v18, %v915_v61 }
 0x2a1   : > { %v918_v51 = vmax.f32 %v812_v22, 0.0  ;;  %v920_v52 = vmax.f32 %v885_v49, 0.0  ;;  %v978_v15 = vmul.f32 %v947_v18, %v914_v47  ;;  %v980_v53 = vmul.f32 %v947_v18, %v916_v48 }
 0x2a2   : > { %v996_v1 = vadd.f32 %v995_v58, %v977_v56  ;;  %v1022_v3 = vadd.f32 %v1021_v29, %v979_v25  ;;  %v981_v0 = vmul.f32 %v951_v20, %v917_v50  ;;  %v983_v7 = vmul.f32 %v951_v20, %v919_v23 }
 0x2a3   : > { %v1009_v5 = vadd.f32 %v1008_v34, %v978_v15  ;;  %v1035_v55 = vadd.f32 %v1034_v35, %v980_v53  ;;  %v982_v57 = vmul.f32 %v951_v20, %v918_v51  ;;  %v984_v59 = vmul.f32 %v951_v20, %v920_v52  ;;  %v815_v4 = vpop.f32.mrb[28].mxu0  ;;  %v888_v62 = vpop.f32.mrb[28].mxu1 }
 0x2a4   : > { %v997_v39 = vadd.f32 %v996_v1, %v981_v0  ;;  %v1023_v8 = vadd.f32 %v1022_v3, %v983_v7  ;;  %v816_v63 = vadd.f32 %v815_v4, %v1622_v38  ;;  %v889_v2 = vadd.f32 %v888_v62, %v1622_v38  ;;  %v817_v54 = vpop.f32.mrb[29].mxu0  ;;  %v890_v10 = vpop.f32.mrb[29].mxu1 }
 0x2a5   : > { %v1010_v13 = vadd.f32 %v1009_v5, %v982_v57  ;;  %v1036_v6 = vadd.f32 %v1035_v55, %v984_v59  ;;  %v818_v9 = vadd.f32 %v817_v54, %v1622_v38  ;;  %v891_v16 = vadd.f32 %v890_v10, %v1622_v38  ;;  %v819_v17 = vpop.f32.mrb[30].mxu0  ;;  %v892_v60 = vpop.f32.mrb[30].mxu1 }
 0x2a6   : > { %v921_v18 = vmax.f32 %v816_v63, 0.0  ;;  %v923_v19 = vmax.f32 %v889_v2, 0.0  ;;  %v820_v21 = vadd.f32 %v819_v17, %v1630_v14  ;;  %v893_v24 = vadd.f32 %v892_v60, %v1630_v14  ;;  %v821_v26 = vpop.f32.mrb[31].mxu0  ;;  %v894_v27 = vpop.f32.mrb[31].mxu1 }
 0x2a7   : > { %v922_v28 = vmax.f32 %v818_v9, 0.0  ;;  %v924_v58 = vmax.f32 %v891_v16, 0.0  ;;  %v822_v29 = vadd.f32 %v821_v26, %v1630_v14  ;;  %v895_v30 = vadd.f32 %v894_v27, %v1630_v14  ;;  %v1048_v2 = vpop.permute.xlu0 %1047 }
 0x2a8   : > { %v925_v32 = vmax.f32 %v820_v21, 0.0  ;;  %v927_v33 = vmax.f32 %v893_v24, 0.0  ;;  %v985_v38 = vmul.f32 %v955_v31, %v921_v18  ;;  %v987_v34 = vmul.f32 %v955_v31, %v923_v19 }
 0x2a9   : > { %v926_v35 = vmax.f32 %v822_v29, 0.0  ;;  %v928_v36 = vmax.f32 %v895_v30, 0.0  ;;  %v986_v37 = vmul.f32 %v955_v31, %v922_v28  ;;  %v988_v40 = vmul.f32 %v955_v31, %v924_v58 }
 0x2aa   : > { %v989_v42 = vmul.f32 %v959_v41, %v925_v32  ;;  %v991_v61 = vmul.f32 %v959_v41, %v927_v33  ;;  %v998_v43 = vadd.f32 %v997_v39, %v985_v38  ;;  %v1024_v44 = vadd.f32 %v1023_v8, %v987_v34 }
 0x2ab   : > { %v990_v45 = vmul.f32 %v959_v41, %v926_v35  ;;  %v992_v46 = vmul.f32 %v959_v41, %v928_v36  ;;  %v1011_v47 = vadd.f32 %v1010_v13, %v986_v37  ;;  %v1037_v48 = vadd.f32 %v1036_v6, %v988_v40 }
 0x2ac   : > { %v999_v22 = vadd.f32 %v998_v43, %v989_v42  ;;  %v1025_v14 = vadd.f32 %v1024_v44, %v991_v61  ;;  %v1341_v0 = vmov 1966171168  }
 0x2ad   : > { %v1012_v49 = vadd.f32 %v1011_v47, %v990_v45  ;;  %v1038_v20 = vadd.f32 %v1037_v48, %v992_v46  ;;  %v1061_v7 = vunpack.c.l.s4 %v1341_v0 }
 0x2ae   : > { %v1000_v50 = vrot.slane %v999_v22, 4  ;;  %v1026_v23 = vrot.slane %v1025_v14, 4 }
 0x2af   : > { %v1013_v56 = vrot.slane %v1012_v49, 4  ;;  %v1039_v25 = vrot.slane %v1038_v20, 4  ;;  %v1062_v63 = vunpack.c.0.s8 %v1061_v7 }
 0x2b0   : > { %v1001_v51 = vadd.f32 %v1000_v50, %v999_v22  ;;  %v1027_v52 = vadd.f32 %v1026_v23, %v1025_v14 }
 0x2b1   : > { %v1014_v15 = vadd.f32 %v1013_v56, %v1012_v49  ;;  %v1040_v53 = vadd.f32 %v1039_v25, %v1038_v20  ;;  %v1065_v18 = vsub.s32 %v1062_v63, %v1488_v12 }
 0x2b2   : > { %v1002_v1 = vrot.slane %v1001_v51, 2  ;;  %v1028_v3 = vrot.slane %v1027_v52, 2 }
 0x2b3   : > { %v1015_v5 = vrot.slane %v1014_v15, 2  ;;  %v1041_v55 = vrot.slane %v1040_v53, 2 }
 0x2b4   : > { %v1003_v57 = vadd.f32 %v1002_v1, %v1001_v51  ;;  %v1029_v59 = vadd.f32 %v1028_v3, %v1027_v52 }
 0x2b5   : > { %v1016_v4 = vadd.f32 %v1015_v5, %v1014_v15  ;;  %v1042_v62 = vadd.f32 %v1041_v55, %v1040_v53 }
 0x2b6   : > { %v1004_v39 = vrot.slane %v1003_v57, 1  ;;  %v1030_v8 = vrot.slane %v1029_v59, 1 }
 0x2b7   : > { %v1017_v54 = vrot.slane %v1016_v4, 1  ;;  %v1043_v10 = vrot.slane %v1042_v62, 1 }
 0x2b8   : > { %v1005_v13 = vadd.f32 %v1004_v39, %v1003_v57  ;;  %v1031_v6 = vadd.f32 %v1030_v8, %v1029_v59 }
 0x2b9   : > { %v1018_v9 = vadd.f32 %v1017_v54, %v1016_v4  ;;  %v1044_v16 = vadd.f32 %v1043_v10, %v1042_v62 }
 0x2ba   : > { %v1050_v17 = vadd.f32 %v1048_v2, %v1005_v13  ;;  %v1052_v60 = vadd.f32 %v1048_v2, %v1031_v6 }
 0x2bb   : > { %v1051_v19 = vadd.f32 %v1048_v2, %v1018_v9  ;;  %v1053_v21 = vadd.f32 %v1048_v2, %v1044_v16 }
 0x2bd   : > { %v1058_v24 = vcombine.low %v1050_v17, %v1051_v19  ;;  %v1059_v26 = vcombine.low %v1052_v60, %v1053_v21 }
 0x2bf   : > { %v1066_v27 = vrot.slane %v1058_v24, %v1065_v18  ;;  %v1073_v28 = vrot.slane %v1059_v26, %v1065_v18 }
 0x2c1   : > { %v1074_v58 = vcombine.low %v1066_v27, %v1073_v28 }
 0x2c3   : > { %v1081_v29 = vrot.slane %v1074_v58, %v1065_v18 }
 0x2c5   : > { %1087 = vst.msk [vmem:[%s189_s8] sm:$0xf] %vm1085_vm1, %v1081_v29 }
 0x2c6   : > { %1284 = shalt.err (!%p1281_p3)
}
 0x2c7   : > { %s1285_s23 = scalar_lea.hbm %s1659_s12, 64  ;;  %s1289_s29 = scalar_lea.hbm %s1705_s4, 128 }
 0x2c8   : > { %p1286_p4 = scmp.ne.s32.totalorder %s1659_s12, %s1285_s23  ;;  %p1290_p9 = scmp.lt.u32.totalorder %s1659_s12, %s1705_s4 }
 0x2c9   : > { %p1291_p10 = scmp.lt.u32.totalorder %s1289_s29, %s1285_s23  ;;  %p1293_p12 = scmp.lt.u32.totalorder %s1285_s23, %s1659_s12 }
 0x2ca   : > { %p1287_p7 = pnand %p1286_p4, %p1406_p5 }
 0x2cb   : > { %p1292_p11 = por %p1291_p10, %p1290_p9 }
 0x2cc   : > { %p1288_p8 = pneg %p1287_p7 }
 0x2cd   : > { %p1294_p13 = por %p1293_p12, %p1292_p11 }
 0x2cf   : > { %p1295_p0 = pnand %p1294_p13, %p1288_p8 }
 0x2d1   : > { %1298 = shalt.err (!%p1295_p0)
}
 0x2d2   : > { %1195 = dma.vmem_to_hbm [thread:$0]  (%p1406_p5), %s1661_s9, 64, %s1659_s12, %s1089_s13  }
 0x2d3 PF: > { %p1201_p1 = scmp.ge.s32.totalorder %s1333_s18, 2  ;;  %s1115_s6 = sand.u32 1, %s1321_s15  }
 0x2d4   : > { %s1116_s7 = scalar_lea.sflag [#allocation3], %s1115_s6 }
 0x2d5   : > { %p1198_p2 = pnand %p1201_p1, %p1410_p6 }
 0x2d7   : > { %1316 = dma.done.wait (!%p1198_p2), %s1116_s7, 64  }
 0x2d8   : > { %1318 = vsyncadd (!%p1198_p2), %s1116_s7, 4294967232  ;;  %p14_p3 = scmp.ge.s32.totalorder %s1393_s21, 4   ;;  %s1708_s15 = smov %s1325_s16 }
 0x2d9   : > { %s1709_s16 = smov %s1329_s17  ;;  %s1710_s17 = smov %s1404_s24 }
 0x2da   : > { %s1711_s18 = smov %s1393_s21  ;;  %16 = sbr.rel (!%p14_p3) target bundleno = 3 (0x3), region = 71 }
 0x2e1   :  { %1121 = vsyncpa [#allocation3], 1 }
 0x2e2   :  { %1123 = vsyncpa [#allocation3 + $0x1], 1 }

</bundles_post_ra>
